<compile_context>
chip_gen: v6e
topology: v6e:2x2x1
jax: 0.10.0
libtpu: 0.0.40
codegen_flags: <defaults>
</compile_context>

<pallas_src>
import math

import jax
import jax.numpy as jnp
from jax.experimental import pallas as pl
from jax.experimental.pallas import tpu as pltpu

# ---- model config (small, deterministic) ----
B = 2        # batch
T = 8        # sequence length
C = 32       # n_embd
N_HEAD = 4   # n_head
HEAD_DIM = C // N_HEAD
LN_EPS = 1e-5
BT = B * T


def _layernorm(x, gamma, beta):
    # x: (T, C); gamma/beta: (1, C). Single-pass variance: E[x^2] - mean^2.
    mean = jnp.mean(x, axis=-1, keepdims=True)
    mean_sq = jnp.mean(x * x, axis=-1, keepdims=True)
    var = jnp.maximum(mean_sq - mean * mean, 0.0)
    return (x - mean) * jax.lax.rsqrt(var + LN_EPS) * gamma + beta


def _gelu_exact(x):
    # PyTorch nn.GELU() default: exact erf-based GELU.
    return 0.5 * x * (1.0 + jax.lax.erf(x * (1.0 / math.sqrt(2.0))))


def bert_block_kernel(
    x_ref,                    # (T, C)   one batch per grid step
    hm_ref,                   # (H, C)   head-selection mask (prebuilt)
    ln1_g_ref, ln1_b_ref,     # (1, C)
    wqkv_ref, bqkv_ref,       # (C, 3C), (1, 3C)  -- Q columns pre-scaled by 1/sqrt(D)
    wp_ref, bp_ref,           # (C, C), (1, C)
    ln2_g_ref, ln2_b_ref,     # (1, C)
    w1_ref, b1_ref,           # (C, 4C), (1, 4C)
    w2_ref, b2_ref,           # (4C, C), (1, C)
    o_ref,                    # (T, C)
):
    x = x_ref[...]
    hm = hm_ref[...]                                                    # (H, C)

    # ---- attention branch ----
    xn = _layernorm(x, ln1_g_ref[...], ln1_b_ref[...])

    # Fused QKV projection (one MXU issue); split is 3 contiguous 32-lane
    # slices (vs. the old 24 per-head 8-lane slices).
    qkv = (jnp.dot(xn, wqkv_ref[...], preferred_element_type=jnp.float32)
           + bqkv_ref[...])                                             # (T, 3C)
    q = qkv[:, :C]                                                      # (T, C)
    k = qkv[:, C:2 * C]                                                 # (T, C)
    v = qkv[:, 2 * C:]                                                  # (T, C)

    # Expand Q across heads on the SUBLANE axis via the head mask:
    # q_exp[h*T + t, c] = q[t, c] * 1[c in head h].  Pure VALU, no lane moves.
    q_exp = (q[None, :, :] * hm[:, None, :]).reshape(N_HEAD * T, C)     # (H*T, C)

    # All heads' scores in one dense slab; attention scale already folded
    # into the Q columns of wqkv at init time.
    s = jax.lax.dot_general(q_exp, k, (((1,), (1,)), ((), ())),
                            preferred_element_type=jnp.float32)         # (H*T, T)

    # Dense softmax over the key axis (single reduce chain for all heads).
    s = s - jnp.max(s, axis=-1, keepdims=True)
    e = jnp.exp(s)
    p = e * pl.reciprocal(jnp.sum(e, axis=-1, keepdims=True), approx=True)

    # y = sum_h P_h @ (V * mask_h): head-batched dot + leading-axis add.
    p_h = p.reshape(N_HEAD, T, T)                                       # (H, T, T)
    v_exp = v[None, :, :] * hm[:, None, :]                              # (H, T, C)
    y = jax.lax.dot_general(p_h, v_exp, (((2,), (1,)), ((0,), (0,))),
                            preferred_element_type=jnp.float32)         # (H, T, C)
    y = jnp.sum(y, axis=0)                                              # (T, C)

    y = jnp.dot(y, wp_ref[...], preferred_element_type=jnp.float32) + bp_ref[...]
    x1 = x + y  # first residual

    # ---- MLP branch ----
    xn2 = _layernorm(x1, ln2_g_ref[...], ln2_b_ref[...])
    h = jnp.dot(xn2, w1_ref[...], preferred_element_type=jnp.float32) + b1_ref[...]
    h = _gelu_exact(h)
    h = jnp.dot(h, w2_ref[...], preferred_element_type=jnp.float32) + b2_ref[...]
    # dropout: eval-mode identity.

    o_ref[...] = x1 + h


def prepare_block_params(params):
    """One-time (init-time) parameter fusion into the kernel layout.

    Hoisted out of the per-call wrapper: builds the fused (C, 3C) QKV weight
    with the 1/sqrt(D) scale folded into the Q columns, (1, N) bias rows, and
    the (H, C) head-selection mask.
    """
    (ln1_g, ln1_b, wq, bq, wk, bk, wv, bv, wp, bp,
     ln2_g, ln2_b, w1, b1, w2, b2) = params

    scale = 1.0 / math.sqrt(HEAD_DIM)
    wqkv = jnp.concatenate([wq * scale, wk, wv], axis=1)            # (C, 3C)
    bqkv = jnp.concatenate([bq * scale, bk, bv], axis=0)[None, :]   # (1, 3C)

    # hm[h, c] = 1.0 iff column c belongs to head h.
    hm = (jnp.arange(C)[None, :] // HEAD_DIM
          == jnp.arange(N_HEAD)[:, None]).astype(jnp.float32)       # (H, C)

    row = lambda v: v[None, :]
    return (hm,
            row(ln1_g), row(ln1_b),
            wqkv, bqkv,
            wp, row(bp),
            row(ln2_g), row(ln2_b),
            w1, row(b1),
            w2, row(b2))


@jax.jit
def bert_block(x, kparams):
    x2d = x.reshape(BT, C)

    x_spec = pl.BlockSpec((T, C), lambda i: (i, 0))
    # Weights/biases/mask: full-shape blocks with a constant block index so
    # they stay resident in VMEM across the (parallel) batch grid steps.
    param_specs = [pl.BlockSpec(p.shape, lambda i: (0, 0)) for p in kparams]

    # Advisory cost estimate (tiny kernel) for XLA's scheduler.
    matmul_flops = B * (2 * T * C * (3 * C)
                        + 2 * (N_HEAD * T) * C * T
                        + 2 * N_HEAD * T * T * C
                        + 2 * T * C * C
                        + 2 * T * C * (4 * C)
                        + 2 * T * (4 * C) * C)
    cost = pl.CostEstimate(
        flops=matmul_flops + 20 * BT * C,
        transcendentals=B * N_HEAD * T * (T + 1) + BT * 4 * C + 2 * BT,
        bytes_accessed=4 * (2 * BT * C + 3 * C * C + C * C + 8 * C * C
                            + N_HEAD * C + 3 * C + 4 * C + 6 * C),
    )

    out2d = pl.pallas_call(
        bert_block_kernel,
        out_shape=jax.ShapeDtypeStruct((BT, C), jnp.float32),
        grid=(B,),
        in_specs=[x_spec] + param_specs,
        out_specs=pl.BlockSpec((T, C), lambda i: (i, 0)),
        compiler_params=pltpu.CompilerParams(
            dimension_semantics=("parallel",)),
        cost_estimate=cost,
    )(x2d, *kparams)

    return out2d.reshape(B, T, C)


def init_params(key):
    keys = jax.random.split(key, 12)
    s = 0.02
    ln1_g = jnp.ones((C,), jnp.float32)
    ln1_b = jnp.zeros((C,), jnp.float32)
    ln2_g = jnp.ones((C,), jnp.float32)
    ln2_b = jnp.zeros((C,), jnp.float32)
    wq = s * jax.random.normal(keys[0], (C, C), jnp.float32)
    bq = s * jax.random.normal(keys[1], (C,), jnp.float32)
    wk = s * jax.random.normal(keys[2], (C, C), jnp.float32)
    bk = s * jax.random.normal(keys[3], (C,), jnp.float32)
    wv = s * jax.random.normal(keys[4], (C, C), jnp.float32)
    bv = s * jax.random.normal(keys[5], (C,), jnp.float32)
    wp = s * jax.random.normal(keys[6], (C, C), jnp.float32)
    bp = s * jax.random.normal(keys[7], (C,), jnp.float32)
    w1 = s * jax.random.normal(keys[8], (C, 4 * C), jnp.float32)
    b1 = s * jax.random.normal(keys[9], (4 * C,), jnp.float32)
    w2 = s * jax.random.normal(keys[10], (4 * C, C), jnp.float32)
    b2 = s * jax.random.normal(keys[11], (C,), jnp.float32)
    return (ln1_g, ln1_b, wq, bq, wk, bk, wv, bv, wp, bp,
            ln2_g, ln2_b, w1, b1, w2, b2)


def bert_block_ref(x, params):
    """Pure-JAX reference mirroring the PyTorch forward (eval mode)."""
    (ln1_g, ln1_b, wq, bq, wk, bk, wv, bv, wp, bp,
     ln2_g, ln2_b, w1, b1, w2, b2) = params

    def ln(x, g, b):
        mu = jnp.mean(x, -1, keepdims=True)
        var = jnp.mean((x - mu) ** 2, -1, keepdims=True)
        return (x - mu) / jnp.sqrt(var + LN_EPS) * g + b

    xn = ln(x, ln1_g, ln1_b)
    q = (xn @ wq + bq).reshape(B, T, N_HEAD, HEAD_DIM).transpose(0, 2, 1, 3)
    k = (xn @ wk + bk).reshape(B, T, N_HEAD, HEAD_DIM).transpose(0, 2, 1, 3)
    v = (xn @ wv + bv).reshape(B, T, N_HEAD, HEAD_DIM).transpose(0, 2, 1, 3)
    att = jnp.einsum('bhtd,bhsd->bhts', q, k) / math.sqrt(HEAD_DIM)
    att = jax.nn.softmax(att, axis=-1)
    y = jnp.einsum('bhts,bhsd->bhtd', att, v).transpose(0, 2, 1, 3).reshape(B, T, C)
    x1 = x + (y @ wp + bp)
    xn2 = ln(x1, ln2_g, ln2_b)
    h = jax.nn.gelu(xn2 @ w1 + b1, approximate=False)
    return x1 + (h @ w2 + b2)


if __name__ == "__main__":
    key = jax.random.PRNGKey(0)
    kx, kp = jax.random.split(key)
    x = jax.random.normal(kx, (B, T, C), jnp.float32)
    att_mask = jnp.ones((B, T), jnp.float32)  # unused by the PyTorch forward path
    params = init_params(kp)
    kparams = prepare_block_params(params)    # one-time, init-style fusion

    out = bert_block(x, kparams)
    out = jax.block_until_ready(out)

    ref = bert_block_ref(x, params)
    assert out.shape == (B, T, C)
    # Tolerance covers the EUP approx-reciprocal softmax normalization.
    assert jnp.allclose(out, ref, atol=2e-4, rtol=2e-4), "mismatch vs reference"
    print("KERNEL_OK")
</pallas_src>

<mosaic_0001>
module attributes {stable_mosaic.version = 11 : i64} {
  func.func @bert_block_kernel(%arg0: i32, %arg1: memref<8x32xf32, #tpu.memory_space<vmem>>, %arg2: memref<4x32xf32, #tpu.memory_space<vmem>>, %arg3: memref<1x32xf32, #tpu.memory_space<vmem>>, %arg4: memref<1x32xf32, #tpu.memory_space<vmem>>, %arg5: memref<32x96xf32, #tpu.memory_space<vmem>>, %arg6: memref<1x96xf32, #tpu.memory_space<vmem>>, %arg7: memref<32x32xf32, #tpu.memory_space<vmem>>, %arg8: memref<1x32xf32, #tpu.memory_space<vmem>>, %arg9: memref<1x32xf32, #tpu.memory_space<vmem>>, %arg10: memref<1x32xf32, #tpu.memory_space<vmem>>, %arg11: memref<32x128xf32, #tpu.memory_space<vmem>>, %arg12: memref<1x128xf32, #tpu.memory_space<vmem>>, %arg13: memref<128x32xf32, #tpu.memory_space<vmem>>, %arg14: memref<1x32xf32, #tpu.memory_space<vmem>>, %arg15: memref<8x32xf32, #tpu.memory_space<vmem>>) attributes {dimension_semantics = [#tpu.dimension_semantics<parallel>], iteration_bounds = array<i64: 2>, scalar_prefetch = 0 : i64, scratch_operands = 0 : i64, tpu.core_type = #tpu.core_type<tc>, window_params = [{transform_indices = @transform_0, window_bounds = array<i64: 8, 32>}, {pipeline_mode = #tpu.pipeline_mode<synchronous>, transform_indices = @transform_1, window_bounds = array<i64: 4, 32>}, {pipeline_mode = #tpu.pipeline_mode<synchronous>, transform_indices = @transform_2, window_bounds = array<i64: 1, 32>}, {pipeline_mode = #tpu.pipeline_mode<synchronous>, transform_indices = @transform_3, window_bounds = array<i64: 1, 32>}, {pipeline_mode = #tpu.pipeline_mode<synchronous>, transform_indices = @transform_4, window_bounds = array<i64: 32, 96>}, {pipeline_mode = #tpu.pipeline_mode<synchronous>, transform_indices = @transform_5, window_bounds = array<i64: 1, 96>}, {pipeline_mode = #tpu.pipeline_mode<synchronous>, transform_indices = @transform_6, window_bounds = array<i64: 32, 32>}, {pipeline_mode = #tpu.pipeline_mode<synchronous>, transform_indices = @transform_7, window_bounds = array<i64: 1, 32>}, {pipeline_mode = #tpu.pipeline_mode<synchronous>, transform_indices = @transform_8, window_bounds = array<i64: 1, 32>}, {pipeline_mode = #tpu.pipeline_mode<synchronous>, transform_indices = @transform_9, window_bounds = array<i64: 1, 32>}, {pipeline_mode = #tpu.pipeline_mode<synchronous>, transform_indices = @transform_10, window_bounds = array<i64: 32, 128>}, {pipeline_mode = #tpu.pipeline_mode<synchronous>, transform_indices = @transform_11, window_bounds = array<i64: 1, 128>}, {pipeline_mode = #tpu.pipeline_mode<synchronous>, transform_indices = @transform_12, window_bounds = array<i64: 128, 32>}, {pipeline_mode = #tpu.pipeline_mode<synchronous>, transform_indices = @transform_13, window_bounds = array<i64: 1, 32>}, {transform_indices = @transform_14, window_bounds = array<i64: 8, 32>}]} {
    %c0 = arith.constant 0 : index
    %c0_0 = arith.constant 0 : index
    %0 = vector.load %arg1[%c0, %c0_0] : memref<8x32xf32, #tpu.memory_space<vmem>>, vector<8x32xf32>
    %c0_1 = arith.constant 0 : index
    %c0_2 = arith.constant 0 : index
    %1 = vector.load %arg2[%c0_1, %c0_2] : memref<4x32xf32, #tpu.memory_space<vmem>>, vector<4x32xf32>
    %c0_3 = arith.constant 0 : index
    %c0_4 = arith.constant 0 : index
    %2 = vector.load %arg3[%c0_3, %c0_4] : memref<1x32xf32, #tpu.memory_space<vmem>>, vector<1x32xf32>
    %c0_5 = arith.constant 0 : index
    %c0_6 = arith.constant 0 : index
    %3 = vector.load %arg4[%c0_5, %c0_6] : memref<1x32xf32, #tpu.memory_space<vmem>>, vector<1x32xf32>
    %cst = arith.constant dense<0.000000e+00> : vector<8xf32>
    %4 = vector.multi_reduction <add>, %0, %cst [1] : vector<8x32xf32> to vector<8xf32>
    %5 = vector.shape_cast %4 : vector<8xf32> to vector<8x1xf32>
    %cst_7 = arith.constant 3.200000e+01 : f32
    %6 = vector.broadcast %cst_7 : f32 to vector<8x1xf32>
    %7 = arith.divf %5, %6 : vector<8x1xf32>
    %8 = arith.mulf %0, %0 : vector<8x32xf32>
    %cst_8 = arith.constant dense<0.000000e+00> : vector<8xf32>
    %9 = vector.multi_reduction <add>, %8, %cst_8 [1] : vector<8x32xf32> to vector<8xf32>
    %10 = vector.shape_cast %9 : vector<8xf32> to vector<8x1xf32>
    %cst_9 = arith.constant 3.200000e+01 : f32
    %11 = vector.broadcast %cst_9 : f32 to vector<8x1xf32>
    %12 = arith.divf %10, %11 : vector<8x1xf32>
    %13 = arith.mulf %7, %7 : vector<8x1xf32>
    %14 = arith.subf %12, %13 : vector<8x1xf32>
    %cst_10 = arith.constant 0.000000e+00 : f32
    %15 = vector.broadcast %cst_10 : f32 to vector<8x1xf32>
    %16 = arith.maximumf %14, %15 : vector<8x1xf32>
    %17 = vector.broadcast %7 : vector<8x1xf32> to vector<8x32xf32>
    %18 = arith.subf %0, %17 : vector<8x32xf32>
    %cst_11 = arith.constant 9.99999974E-6 : f32
    %19 = vector.broadcast %cst_11 : f32 to vector<8x1xf32>
    %20 = arith.addf %16, %19 : vector<8x1xf32>
    %21 = math.rsqrt %20 : vector<8x1xf32>
    %22 = vector.broadcast %21 : vector<8x1xf32> to vector<8x32xf32>
    %23 = arith.mulf %18, %22 : vector<8x32xf32>
    %24 = vector.broadcast %2 : vector<1x32xf32> to vector<8x32xf32>
    %25 = arith.mulf %23, %24 : vector<8x32xf32>
    %26 = vector.broadcast %3 : vector<1x32xf32> to vector<8x32xf32>
    %27 = arith.addf %25, %26 : vector<8x32xf32>
    %c0_12 = arith.constant 0 : index
    %c0_13 = arith.constant 0 : index
    %28 = vector.load %arg5[%c0_12, %c0_13] : memref<32x96xf32, #tpu.memory_space<vmem>>, vector<32x96xf32>
    %cst_14 = arith.constant dense<0.000000e+00> : vector<8x96xf32>
    %29 = tpu.matmul %27, %28, %cst_14 {dimension_numbers = #tpu.dot_dimension_numbers<[1], [0], [0], [1], [0, 0, 1, 1], [], []>} : vector<8x32xf32>, vector<32x96xf32>, vector<8x96xf32> -> vector<8x96xf32>
    %c0_15 = arith.constant 0 : index
    %c0_16 = arith.constant 0 : index
    %30 = vector.load %arg6[%c0_15, %c0_16] : memref<1x96xf32, #tpu.memory_space<vmem>>, vector<1x96xf32>
    %31 = vector.broadcast %30 : vector<1x96xf32> to vector<8x96xf32>
    %32 = arith.addf %29, %31 : vector<8x96xf32>
    %33 = vector.extract_strided_slice %32 {offsets = [0, 0], sizes = [8, 32], strides = [1, 1]} : vector<8x96xf32> to vector<8x32xf32>
    %34 = vector.extract_strided_slice %32 {offsets = [0, 32], sizes = [8, 32], strides = [1, 1]} : vector<8x96xf32> to vector<8x32xf32>
    %35 = vector.extract_strided_slice %32 {offsets = [0, 64], sizes = [8, 32], strides = [1, 1]} : vector<8x96xf32> to vector<8x32xf32>
    %36 = vector.shape_cast %33 : vector<8x32xf32> to vector<1x8x32xf32>
    %37 = vector.shape_cast %1 : vector<4x32xf32> to vector<4x1x32xf32>
    %38 = vector.broadcast %36 : vector<1x8x32xf32> to vector<4x8x32xf32>
    %39 = vector.broadcast %37 : vector<4x1x32xf32> to vector<4x8x32xf32>
    %40 = arith.mulf %38, %39 : vector<4x8x32xf32>
    %41 = vector.shape_cast %40 : vector<4x8x32xf32> to vector<32x32xf32>
    %cst_17 = arith.constant dense<0.000000e+00> : vector<32x8xf32>
    %42 = tpu.matmul %41, %34, %cst_17 {dimension_numbers = #tpu.dot_dimension_numbers<[1], [1], [0], [0], [0, 0, 1, 0], [], []>} : vector<32x32xf32>, vector<8x32xf32>, vector<32x8xf32> -> vector<32x8xf32>
    %cst_18 = arith.constant dense<0xFF800000> : vector<32xf32>
    %43 = vector.multi_reduction <maximumf>, %42, %cst_18 [1] : vector<32x8xf32> to vector<32xf32>
    %44 = vector.shape_cast %43 : vector<32xf32> to vector<32x1xf32>
    %45 = vector.broadcast %44 : vector<32x1xf32> to vector<32x8xf32>
    %46 = arith.subf %42, %45 : vector<32x8xf32>
    %47 = math.exp %46 : vector<32x8xf32>
    %cst_19 = arith.constant dense<0.000000e+00> : vector<32xf32>
    %48 = vector.multi_reduction <add>, %47, %cst_19 [1] : vector<32x8xf32> to vector<32xf32>
    %49 = vector.shape_cast %48 : vector<32xf32> to vector<32x1xf32>
    %50 = tpu.reciprocal %49 {approx = true} : vector<32x1xf32> -> vector<32x1xf32>
    %51 = vector.broadcast %50 : vector<32x1xf32> to vector<32x8xf32>
    %52 = arith.mulf %47, %51 : vector<32x8xf32>
    %53 = vector.shape_cast %52 : vector<32x8xf32> to vector<4x8x8xf32>
    %54 = vector.shape_cast %35 : vector<8x32xf32> to vector<1x8x32xf32>
    %55 = vector.shape_cast %1 : vector<4x32xf32> to vector<4x1x32xf32>
    %56 = vector.broadcast %54 : vector<1x8x32xf32> to vector<4x8x32xf32>
    %57 = vector.broadcast %55 : vector<4x1x32xf32> to vector<4x8x32xf32>
    %58 = arith.mulf %56, %57 : vector<4x8x32xf32>
    %cst_20 = arith.constant dense<0.000000e+00> : vector<4x8x32xf32>
    %59 = tpu.matmul %53, %58, %cst_20 {dimension_numbers = #tpu.dot_dimension_numbers<[2], [1], [1], [2], [0, 0, 0, 1, 1, 2], [0], [0]>} : vector<4x8x8xf32>, vector<4x8x32xf32>, vector<4x8x32xf32> -> vector<4x8x32xf32>
    %cst_21 = arith.constant dense<0.000000e+00> : vector<8x32xf32>
    %60 = vector.multi_reduction <add>, %59, %cst_21 [0] : vector<4x8x32xf32> to vector<8x32xf32>
    %c0_22 = arith.constant 0 : index
    %c0_23 = arith.constant 0 : index
    %61 = vector.load %arg7[%c0_22, %c0_23] : memref<32x32xf32, #tpu.memory_space<vmem>>, vector<32x32xf32>
    %cst_24 = arith.constant dense<0.000000e+00> : vector<8x32xf32>
    %62 = tpu.matmul %60, %61, %cst_24 {dimension_numbers = #tpu.dot_dimension_numbers<[1], [0], [0], [1], [0, 0, 1, 1], [], []>} : vector<8x32xf32>, vector<32x32xf32>, vector<8x32xf32> -> vector<8x32xf32>
    %c0_25 = arith.constant 0 : index
    %c0_26 = arith.constant 0 : index
    %63 = vector.load %arg8[%c0_25, %c0_26] : memref<1x32xf32, #tpu.memory_space<vmem>>, vector<1x32xf32>
    %64 = vector.broadcast %63 : vector<1x32xf32> to vector<8x32xf32>
    %65 = arith.addf %62, %64 : vector<8x32xf32>
    %66 = arith.addf %0, %65 : vector<8x32xf32>
    %c0_27 = arith.constant 0 : index
    %c0_28 = arith.constant 0 : index
    %67 = vector.load %arg9[%c0_27, %c0_28] : memref<1x32xf32, #tpu.memory_space<vmem>>, vector<1x32xf32>
    %c0_29 = arith.constant 0 : index
    %c0_30 = arith.constant 0 : index
    %68 = vector.load %arg10[%c0_29, %c0_30] : memref<1x32xf32, #tpu.memory_space<vmem>>, vector<1x32xf32>
    %cst_31 = arith.constant dense<0.000000e+00> : vector<8xf32>
    %69 = vector.multi_reduction <add>, %66, %cst_31 [1] : vector<8x32xf32> to vector<8xf32>
    %70 = vector.shape_cast %69 : vector<8xf32> to vector<8x1xf32>
    %cst_32 = arith.constant 3.200000e+01 : f32
    %71 = vector.broadcast %cst_32 : f32 to vector<8x1xf32>
    %72 = arith.divf %70, %71 : vector<8x1xf32>
    %73 = arith.mulf %66, %66 : vector<8x32xf32>
    %cst_33 = arith.constant dense<0.000000e+00> : vector<8xf32>
    %74 = vector.multi_reduction <add>, %73, %cst_33 [1] : vector<8x32xf32> to vector<8xf32>
    %75 = vector.shape_cast %74 : vector<8xf32> to vector<8x1xf32>
    %cst_34 = arith.constant 3.200000e+01 : f32
    %76 = vector.broadcast %cst_34 : f32 to vector<8x1xf32>
    %77 = arith.divf %75, %76 : vector<8x1xf32>
    %78 = arith.mulf %72, %72 : vector<8x1xf32>
    %79 = arith.subf %77, %78 : vector<8x1xf32>
    %cst_35 = arith.constant 0.000000e+00 : f32
    %80 = vector.broadcast %cst_35 : f32 to vector<8x1xf32>
    %81 = arith.maximumf %79, %80 : vector<8x1xf32>
    %82 = vector.broadcast %72 : vector<8x1xf32> to vector<8x32xf32>
    %83 = arith.subf %66, %82 : vector<8x32xf32>
    %cst_36 = arith.constant 9.99999974E-6 : f32
    %84 = vector.broadcast %cst_36 : f32 to vector<8x1xf32>
    %85 = arith.addf %81, %84 : vector<8x1xf32>
    %86 = math.rsqrt %85 : vector<8x1xf32>
    %87 = vector.broadcast %86 : vector<8x1xf32> to vector<8x32xf32>
    %88 = arith.mulf %83, %87 : vector<8x32xf32>
    %89 = vector.broadcast %67 : vector<1x32xf32> to vector<8x32xf32>
    %90 = arith.mulf %88, %89 : vector<8x32xf32>
    %91 = vector.broadcast %68 : vector<1x32xf32> to vector<8x32xf32>
    %92 = arith.addf %90, %91 : vector<8x32xf32>
    %c0_37 = arith.constant 0 : index
    %c0_38 = arith.constant 0 : index
    %93 = vector.load %arg11[%c0_37, %c0_38] : memref<32x128xf32, #tpu.memory_space<vmem>>, vector<32x128xf32>
    %cst_39 = arith.constant dense<0.000000e+00> : vector<8x128xf32>
    %94 = tpu.matmul %92, %93, %cst_39 {dimension_numbers = #tpu.dot_dimension_numbers<[1], [0], [0], [1], [0, 0, 1, 1], [], []>} : vector<8x32xf32>, vector<32x128xf32>, vector<8x128xf32> -> vector<8x128xf32>
    %c0_40 = arith.constant 0 : index
    %c0_41 = arith.constant 0 : index
    %95 = vector.load %arg12[%c0_40, %c0_41] : memref<1x128xf32, #tpu.memory_space<vmem>>, vector<1x128xf32>
    %96 = vector.broadcast %95 : vector<1x128xf32> to vector<8x128xf32>
    %97 = arith.addf %94, %96 : vector<8x128xf32>
    %cst_42 = arith.constant 5.000000e-01 : f32
    %98 = vector.broadcast %cst_42 : f32 to vector<8x128xf32>
    %99 = arith.mulf %98, %97 : vector<8x128xf32>
    %cst_43 = arith.constant 0.707106769 : f32
    %100 = vector.broadcast %cst_43 : f32 to vector<8x128xf32>
    %101 = arith.mulf %97, %100 : vector<8x128xf32>
    %102 = math.erf %101 : vector<8x128xf32>
    %cst_44 = arith.constant 1.000000e+00 : f32
    %103 = vector.broadcast %cst_44 : f32 to vector<8x128xf32>
    %104 = arith.addf %103, %102 : vector<8x128xf32>
    %105 = arith.mulf %99, %104 : vector<8x128xf32>
    %c0_45 = arith.constant 0 : index
    %c0_46 = arith.constant 0 : index
    %106 = vector.load %arg13[%c0_45, %c0_46] : memref<128x32xf32, #tpu.memory_space<vmem>>, vector<128x32xf32>
    %cst_47 = arith.constant dense<0.000000e+00> : vector<8x32xf32>
    %107 = tpu.matmul %105, %106, %cst_47 {dimension_numbers = #tpu.dot_dimension_numbers<[1], [0], [0], [1], [0, 0, 1, 1], [], []>} : vector<8x128xf32>, vector<128x32xf32>, vector<8x32xf32> -> vector<8x32xf32>
    %c0_48 = arith.constant 0 : index
    %c0_49 = arith.constant 0 : index
    %108 = vector.load %arg14[%c0_48, %c0_49] : memref<1x32xf32, #tpu.memory_space<vmem>>, vector<1x32xf32>
    %109 = vector.broadcast %108 : vector<1x32xf32> to vector<8x32xf32>
    %110 = arith.addf %107, %109 : vector<8x32xf32>
    %111 = arith.addf %66, %110 : vector<8x32xf32>
    %c0_50 = arith.constant 0 : index
    %c0_51 = arith.constant 0 : index
    %112 = vector.load %arg15[%c0_50, %c0_51] : memref<8x32xf32, #tpu.memory_space<vmem>>, vector<8x32xf32>
    tpu.vector_store %arg15[%c0_50, %c0_51], %111 {strides = array<i32>} : memref<8x32xf32, #tpu.memory_space<vmem>>, vector<8x32xf32>,
    return
  }
  func.func @transform_0(%arg0: i32) -> (i32, i32) {
    %c0_i32 = arith.constant 0 : i32
    %c0_i32_0 = arith.constant 0 : i32
    return %arg0, %c0_i32 : i32, i32
  }
  func.func @transform_1(%arg0: i32) -> (i32, i32) {
    %c0_i32 = arith.constant 0 : i32
    %c0_i32_0 = arith.constant 0 : i32
    %c0_i32_1 = arith.constant 0 : i32
    return %c0_i32, %c0_i32_0 : i32, i32
  }
  func.func @transform_2(%arg0: i32) -> (i32, i32) {
    %c0_i32 = arith.constant 0 : i32
    %c0_i32_0 = arith.constant 0 : i32
    %c0_i32_1 = arith.constant 0 : i32
    return %c0_i32, %c0_i32_0 : i32, i32
  }
  func.func @transform_3(%arg0: i32) -> (i32, i32) {
    %c0_i32 = arith.constant 0 : i32
    %c0_i32_0 = arith.constant 0 : i32
    %c0_i32_1 = arith.constant 0 : i32
    return %c0_i32, %c0_i32_0 : i32, i32
  }
  func.func @transform_4(%arg0: i32) -> (i32, i32) {
    %c0_i32 = arith.constant 0 : i32
    %c0_i32_0 = arith.constant 0 : i32
    %c0_i32_1 = arith.constant 0 : i32
    return %c0_i32, %c0_i32_0 : i32, i32
  }
  func.func @transform_5(%arg0: i32) -> (i32, i32) {
    %c0_i32 = arith.constant 0 : i32
    %c0_i32_0 = arith.constant 0 : i32
    %c0_i32_1 = arith.constant 0 : i32
    return %c0_i32, %c0_i32_0 : i32, i32
  }
  func.func @transform_6(%arg0: i32) -> (i32, i32) {
    %c0_i32 = arith.constant 0 : i32
    %c0_i32_0 = arith.constant 0 : i32
    %c0_i32_1 = arith.constant 0 : i32
    return %c0_i32, %c0_i32_0 : i32, i32
  }
  func.func @transform_7(%arg0: i32) -> (i32, i32) {
    %c0_i32 = arith.constant 0 : i32
    %c0_i32_0 = arith.constant 0 : i32
    %c0_i32_1 = arith.constant 0 : i32
    return %c0_i32, %c0_i32_0 : i32, i32
  }
  func.func @transform_8(%arg0: i32) -> (i32, i32) {
    %c0_i32 = arith.constant 0 : i32
    %c0_i32_0 = arith.constant 0 : i32
    %c0_i32_1 = arith.constant 0 : i32
    return %c0_i32, %c0_i32_0 : i32, i32
  }
  func.func @transform_9(%arg0: i32) -> (i32, i32) {
    %c0_i32 = arith.constant 0 : i32
    %c0_i32_0 = arith.constant 0 : i32
    %c0_i32_1 = arith.constant 0 : i32
    return %c0_i32, %c0_i32_0 : i32, i32
  }
  func.func @transform_10(%arg0: i32) -> (i32, i32) {
    %c0_i32 = arith.constant 0 : i32
    %c0_i32_0 = arith.constant 0 : i32
    %c0_i32_1 = arith.constant 0 : i32
    return %c0_i32, %c0_i32_0 : i32, i32
  }
  func.func @transform_11(%arg0: i32) -> (i32, i32) {
    %c0_i32 = arith.constant 0 : i32
    %c0_i32_0 = arith.constant 0 : i32
    %c0_i32_1 = arith.constant 0 : i32
    return %c0_i32, %c0_i32_0 : i32, i32
  }
  func.func @transform_12(%arg0: i32) -> (i32, i32) {
    %c0_i32 = arith.constant 0 : i32
    %c0_i32_0 = arith.constant 0 : i32
    %c0_i32_1 = arith.constant 0 : i32
    return %c0_i32, %c0_i32_0 : i32, i32
  }
  func.func @transform_13(%arg0: i32) -> (i32, i32) {
    %c0_i32 = arith.constant 0 : i32
    %c0_i32_0 = arith.constant 0 : i32
    %c0_i32_1 = arith.constant 0 : i32
    return %c0_i32, %c0_i32_0 : i32, i32
  }
  func.func @transform_14(%arg0: i32) -> (i32, i32) {
    %c0_i32 = arith.constant 0 : i32
    %c0_i32_0 = arith.constant 0 : i32
    return %arg0, %c0_i32 : i32, i32
  }
}

</mosaic_0001>

<bundles_post_ra>
// kernel: bert_block.1
= control target key start
LH: loop header
LB: loop body
LE: loop exit
PB: predicated region body
PF: predicated region fallthrough
CT: control target
= control target key end

     0   :  { %s2174_s0 = inlined_call_operand.vmem [shape: f32[16,32], index: 0, kind: input, shape index: {}]   ;;  %s2175_s1 = inlined_call_operand.vmem [shape: f32[4,32], index: 1, kind: input, shape index: {}]   ;;  %s2176_s2 = inlined_call_operand.vmem [shape: f32[1,32], index: 2, kind: input, shape index: {}]   ;;  %s2177_s3 = inlined_call_operand.vmem [shape: f32[1,32], index: 3, kind: input, shape index: {}]   ;;  %s2178_s4 = inlined_call_operand.vmem [shape: f32[32,96], index: 4, kind: input, shape index: {}]   ;;  %s2179_s5 = inlined_call_operand.vmem [shape: f32[1,96], index: 5, kind: input, shape index: {}]   ;;  %s2180_s6 = inlined_call_operand.vmem [shape: f32[32,32], index: 6, kind: input, shape index: {}]   ;;  %s2181_s7 = inlined_call_operand.vmem [shape: f32[1,32], index: 7, kind: input, shape index: {}]   ;;  %s2182_s8 = inlined_call_operand.vmem [shape: f32[1,32], index: 8, kind: input, shape index: {}]   ;;  %s2183_s9 = inlined_call_operand.vmem [shape: f32[1,32], index: 9, kind: input, shape index: {}]   ;;  %s2184_s10 = inlined_call_operand.vmem [shape: f32[32,128], index: 10, kind: input, shape index: {}]   ;;  %s2185_s11 = inlined_call_operand.vmem [shape: f32[1,128], index: 11, kind: input, shape index: {}]   ;;  %s2186_s12 = inlined_call_operand.vmem [shape: f32[128,32], index: 12, kind: input, shape index: {}]   ;;  %s2187_s13 = inlined_call_operand.vmem [shape: f32[1,32], index: 13, kind: input, shape index: {}]   ;;  %s2188_s14 = inlined_call_operand.hbm [shape: f32[16,32], index: 14, kind: output, shape index: {}]  }
   0x1   :  { %2189 = sst [smem:[#allocation5_spill]] %s2174_s0 }
   0x2   :  { %2190 = sst [smem:[#allocation6_spill]] %s2175_s1 }
   0x3   :  { %2191 = sst [smem:[#allocation7_spill]] %s2176_s2 }
   0x4   :  { %2192 = sst [smem:[#allocation8_spill]] %s2177_s3 }
   0x5   :  { %2193 = sst [smem:[#allocation9_spill]] %s2178_s4 }
   0x6   :  { %19 = vsyncpa [#allocation3], 0 }
   0x7   :  { %21 = vsyncpa [#allocation3 + $0x1], 0  ;;  %s1865_s29 = smov 0   ;;  %s1867_s30 = smov 0  }
   0x8   :  { %s1869_s15 = smov 0   ;;  %s1871_s16 = smov 0  }
   0x9 LB: > { %s1886_s17 = sadd.s32 4294967295, %s1782_s16   ;;  %s1484_s18 = sadd.s32 4294967294, %s1782_s16   ;;  %s1782_s16 = sphi %s1871_s16, %s2204_s16   ;;  %s1778_s15 = sphi %s1869_s15, %s2203_s15   ;;  %s1774_s30 = sphi %s1867_s30, %s2202_s30   ;;  %s1770_s29 = sphi %s1865_s29, %s2201_s29  }
   0xa   : > { %s1890_s19 = sadd.s32 1, %s1782_s16   ;;  %s333_s20 = sadd.s32 1, %s1778_s15 }
   0xb   : > { %s330_s21 = ssub.s32 %s1782_s16, %s1890_s19  ;;  %p343_p0 = scmp.ne.s32.totalorder %s1778_s15, %s1774_s30 }
   0xc   : > { %p331_p1 = scmp.eq.s32.totalorder %s330_s21, 0  ;;  %p344_p2 = scmp.eq.s32.totalorder %s1886_s17, 1 }
   0xd   : > { %p349_p3 = scmp.ne.s32.totalorder %s1774_s30, %s1770_s29  ;;  %p350_p4 = scmp.eq.s32.totalorder %s1484_s18, 1 }
   0xe   : > { %s1901_s22 = scalar_select %p331_p1, %s1778_s15, %s333_s20  }
   0xf   : > { %p1903_p5 = por %p344_p2, %p343_p0  ;;  %p1907_p6 = por %p350_p4, %p349_p3 }
  0x10   : > { %p1487_p7 = scmp.ge.s32.totalorder %s1782_s16, 1  ;;  %p414_p8 = scmp.lt.s32.totalorder %s1782_s16, 3 }
  0x12   : > { %p415_p9 = pnand %p1487_p7, %p414_p8 }
  0x13   : > { %p459_p10 = scmp.lt.s32.totalorder (!%p415_p9), %s1886_s17, 1  ;;  %s2196_s0 = sld [smem:[#allocation5_spill]] (!%p415_p9) }
  0x14   : > { %418 = sbr.rel (%p415_p9) target bundleno = 2045 (0x7fd), region = 76  ;;  %s2197_s4 = sld [smem:[#allocation9_spill]] (!%p415_p9) }
  0x15   : > { %s2198_s2 = sld [smem:[#allocation7_spill]] (!%p415_p9)  ;;  %s1512_s20 = sshll.u32 (!%p415_p9), %s1886_s17, 7 }
  0x16   : > { %s2199_s3 = sld [smem:[#allocation8_spill]] (!%p415_p9) }
  0x17   : > { %s2200_s1 = sld [smem:[#allocation6_spill]] (!%p415_p9) }
  0x19   : > { %s460_s25 = scalar_select %p459_p10, %s1886_s17, 1  ;;  %vm467_vm0 = vcmask 261120   ;;  %v1784_v5 = vmov 0.0   ;;  %vm1785_vm1 = vmmov 0   ;;  %v1786_v24 = vmov 1966171168  }
  0x1a   : > { %v502_v4 = vld [vmem:[%s2197_s4 + $0x18] sm:$0xff]  ;;  %1560 = vmatprep.subr.mxu1 %v1784_v5  ;;  %v501_v6 = vld [vmem:[%s2197_s4 + $0x10] sm:$0xff]  ;;  %1568 = vmatprep.mubr.msk.f32.mxu1 %vm1785_vm1, %v1784_v5  ;;  %v500_v7 = vld [vmem:[%s2197_s4 + $0x8] sm:$0xff]  ;;  %v593_v25 = vunpack.c.l.s4 %v1786_v24  ;;  %v595_v26 = vlaneseq  ;;  %vm734_vm2 = vcmask 64512   ;;  %s1789_s17 = smov [#allocation2]  }
  0x1b   : > { %s1489_s26 = sshll.u32 %s460_s25, 3  ;;  %1561 = vmatpush3.msra.mxu1 %v502_v4  ;;  %1579 = vmatprep.subr.mxu0 %v1784_v5  ;;  %v499_v8 = vld [vmem:[%s2197_s4] sm:$0xff]  ;;  %s1787_s25 = smov 96  }
  0x1c   : > { %s462_s18 = scalar_lea.vmem %s2196_s0, %s1489_s26  ;;  %1562 = vmatprep.subr.mxu1 %v1784_v5  ;;  %1581 = vmatprep.mubr.msk.f32.mxu0 %vm1785_vm1, %v1784_v5  ;;  %v1490_v19 = vld [vmem:[%s2198_s2] ss:$0 sm:$0xff]  ;;  %v594_v27 = vunpack.c.0.s8 %v593_v25  ;;  %v596_v28 = vshrl.u32 %v595_v26, 7  ;;  %s1788_s26 = smov 64  }
  0x1d   : > { %v1918_v0 = vld [vmem:[%s462_s18] sm:$0xff]  ;;  %1563 = vmatpush3.msra.mxu1 %v501_v6  ;;  %s456_s0 = sand.u32 1, %s1774_s30   ;;  %s1423_s2 = scalar_lea.hbm %s2188_s14, %s1512_s20 }
  0x1e   : > { %v468_v1 = vsel %vm467_vm0, %v1918_v0, 0.0  ;;  %v473_v2 = vmul.f32 %v1918_v0, %v1918_v0  ;;  %1564 = vmatprep.subr.mxu1 %v1784_v5  ;;  %v1491_v21 = vld [vmem:[%s2199_s3] ss:$0 sm:$0xff]  ;;  %v597_v31 = vsub.s32 %v594_v27, %v596_v28  ;;  %v610_v34 = vsub.s32 0, %v596_v28  ;;  %s1488_s27 = sshll.u32 %s456_s0, 3  ;;  %s1412_s3 = scalar_lea.sflag [#allocation3], %s456_s0 }
  0x1f   : > { %469 = vadd.xlane.f32.xlu0 %v468_v1  ;;  %1565 = vmatpush3.msra.mxu1 %v500_v7  ;;  %v1494_v29 = vld.sshfl [vmem:[%s2200_s1] sm:$0x33 pattern:$0x75316420]  ;;  %s458_s21 = scalar_lea.vmem [#allocation2], %s1488_s27  ;;  %s1726_s27 = sshll.u32 %s1789_s17, 4  ;;  %s1727_s27 = int_to_ptr.vmem [resolvable:$false] %s1726_s27 }
  0x20   : > { %v474_v3 = vsel %vm467_vm0, %v473_v2, 0.0  ;;  %1566 = vmatprep.subr.mxu1 %v1784_v5  ;;  %v591_v30 = vcombine.high %v1494_v29, %v1494_v29  ;;  %v598_v32 = vrot.slane %v1494_v29, %v597_v31  ;;  %v1492_v40 = vld [vmem:[%s2179_s5] ss:$0 sm:$0xff]  ;;  %s1728_s28 = scalar_lea.vmem %s1727_s27, 256 }
  0x21   : > { %1567 = vmatpush3.msra.mxu1 %v499_v8 }
  0x22   : > { %v605_v33 = vrot.slane %v591_v30, %v597_v31  ;;  %v606_v35 = vcombine.high %v598_v32, %v598_v32  ;;  %v611_v41 = vrot.slane %v598_v32, %v610_v34 }
  0x23   : > { %475 = vadd.xlane.f32.xlu0 %v474_v3 }
  0x24   : > { %v607_v36 = vcombine.high %v605_v33, %v605_v33  ;;  %v615_v37 = vrot.slane %v605_v33, %v610_v34  ;;  %v619_v38 = vrot.slane %v606_v35, %v610_v34 }
  0x26   : > { %v623_v39 = vrot.slane %v607_v36, %v610_v34 }
  0xa8   : > { %v470_v9 = vpop.xlane.xlu0 %469 }
  0xa9   : > { %v472_v10 = vmul.f32 0.03125, %v470_v9 }
  0xab   : > { %v478_v12 = vmul.f32 %v472_v10, %v472_v10  ;;  %v481_v17 = vsub.f32 %v1918_v0, %v472_v10 }
  0xac   : > { %v476_v11 = vpop.xlane.xlu0 %475 }
  0xad   : > { %v477_v13 = vmul.f32 0.03125, %v476_v11 }
  0xaf   : > { %v479_v14 = vsub.f32 %v477_v13, %v478_v12 }
  0xb1   : > { %v480_v15 = vmax.f32 %v479_v14, 0.0 }
  0xb3   : > { %v482_v16 = vadd.f32 1e-05, %v480_v15 }
  0xb5   : > { %1700 = vrsqrt.f32 %v482_v16 }
  0xc2   : > { %v1701_v18 = vpop.eup %1700 }
  0xc3   : > { %v484_v20 = vmul.f32 %v1701_v18, %v481_v17 }
  0xc5   : > { %v491_v22 = vmul.f32 %v1490_v19, %v484_v20 }
  0xc7   : > { %v498_v23 = vadd.f32 %v1491_v21, %v491_v22 }
  0xc9   : > { %1569 = vmatmul.mubr.msk.f32.vlgmr.msra.gmra.mxu1 %vm467_vm0, %v498_v23 }
 0x189   : > { %v579_v42 = vpop.f32.mrf.mxu1 }
 0x18a   : > { %v1960_v43 = vadd.f32 %v1492_v40, %v579_v42  ;;  %v1113_v40 = vld [vmem:[%s2180_s6 + $0x18] sm:$0xff]  ;;  %v1111_v42 = vld [vmem:[%s2180_s6 + $0x8] sm:$0xff] }
 0x18b   : > { %v1570_v44 = vpop.f32.mrf.mxu1 }
 0x18c   : > { %633 = vrot.lane.b32.xlu1 %v1960_v43, %s1787_s25  ;;  %v628_v45 = vmul.f32 %v611_v41, %v1960_v43  ;;  %v629_v47 = vmul.f32 %v615_v37, %v1960_v43  ;;  %v630_v48 = vmul.f32 %v619_v38, %v1960_v43  ;;  %v631_v49 = vmul.f32 %v623_v39, %v1960_v43  ;;  %s1425_s25 = sshll.u32 %s458_s21, 4  ;;  %s1426_s25 = int_to_ptr.vmem [resolvable:$true] %s1425_s25 }
 0x18d   : > { %s1722_s4 = scalar_lea.vmem %s1426_s25, 128  ;;  %p1729_p0 = scmp.lt.s32.totalorder %s1426_s25, %s1727_s27 }
 0x18e   : > { %1573 = vmatprep.mubr.msk.f32.mxu1 %vm467_vm0, %v628_v45  ;;  %p1723_p11 = scmp.ne.s32.totalorder %s1426_s25, %s1722_s4  ;;  %p1730_p1 = scmp.lt.s32.totalorder %s1728_s28, %s1722_s4 }
 0x190   : > { %p1724_p12 = pnand %p1723_p11, %p1903_p5  ;;  %p1731_p2 = por %p1730_p1, %p1729_p0 }
 0x192   : > { %p1725_p13 = pneg %p1724_p12 }
 0x194   : > { %p1732_p3 = pnand %p1731_p2, %p1725_p13 }
 0x1fe   : > { %v634_v46 = vpop.permute.xlu1 %633 }
 0x1ff   : > { %1571 = vmatprep.subr.msk.mxu1 %vm467_vm0, %v634_v46 }
 0x200   : > { %1572 = vmatpush3.xpose.msk.msra.mxu1 %vm467_vm0, %v634_v46 }
 0x201   : > { %1584 = vmatprep.subr.mxu1 %v1784_v5 }
 0x203   : > { %1574 = vmatmul.mubr.msk.f32.vlgmr.msra.gmra.mxu1 %vm467_vm0, %v629_v47 }
 0x204   : > { %1576 = vmatprep.mubr.msk.f32.mxu1 %vm467_vm0, %v630_v48 }
 0x207   : > { %1577 = vmatmul.mubr.msk.f32.gmra.mxu1 %vm467_vm0, %v631_v49 }
 0x208   : > { %1586 = vmatprep.mubr.msk.f32.mxu1 %vm1785_vm1, %v1784_v5 }
 0x2c3   : > { %v1575_v50 = vpop.f32.mrf.mxu1 }
 0x2c4   : > { %v738_v51 = vsel %vm734_vm2, %v1575_v50, -inf }
 0x2c5   : > { %739 = vmax.xlane.f32.xlu0 %v738_v51  ;;  %v715_v52 = vpop.f32.mrf.mxu1 }
 0x2c6   : > { %v735_v53 = vsel %vm734_vm2, %v715_v52, -inf }
 0x2c7   : > { %736 = vmax.xlane.f32.xlu1 %v735_v53  ;;  %v1578_v54 = vpop.f32.mrf.mxu1 }
 0x2c8   : > { %v744_v57 = vsel %vm734_vm2, %v1578_v54, -inf }
 0x2c9   : > { %v725_v55 = vpop.f32.mrf.mxu1 }
 0x2ca   : > { %v741_v56 = vsel %vm734_vm2, %v725_v55, -inf }
 0x2cb   : > { %742 = vmax.xlane.f32.xlu0 %v741_v56 }
 0x2cf   : > { %745 = vmax.xlane.f32.xlu0 %v744_v57 }
 0x2d8   : > { %781 = vrot.lane.b32.xlu1 %v615_v37, %s1788_s26 }
 0x2e5   : > { %779 = vrot.lane.b32.xlu0 %v611_v41, %s1788_s26  ;;  %v1112_v41 = vld [vmem:[%s2180_s6 + $0x10] sm:$0xff] }
 0x2e9   : > { %783 = vrot.lane.b32.xlu0 %v619_v38, %s1788_s26 }
 0x2ed   : > { %785 = vrot.lane.b32.xlu0 %v623_v39, %s1788_s26 }
 0x34e   : > { %v740_v58 = vpop.xlane.xlu0 %739 }
 0x34f   : > { %v748_v3 = vsub.f32 %v1575_v50, %v740_v58 }
 0x350   : > { %v737_v59 = vpop.xlane.xlu1 %736 }
 0x351   : > { %v747_v4 = vsub.f32 %v715_v52, %v737_v59  ;;  %v753_v6 = vmul.f32 1.442695, %v748_v3  ;;  %v1504_v59 = vld [vmem:[%s2181_s7] ss:$0 sm:$0xff] }
 0x353   : > { %v751_v7 = vmul.f32 1.442695, %v747_v4  ;;  %1702 = vpow2.f32 %v753_v6  ;;  %v1230_v4 = vld [vmem:[%s2184_s10 + $0x18] sm:$0xff]  ;;  %v1229_v6 = vld [vmem:[%s2184_s10 + $0x10] sm:$0xff] }
 0x354   : > { %v782_v60 = vpop.permute.xlu1 %781  ;;  %v743_v61 = vpop.xlane.xlu0 %742 }
 0x355   : > { %v792_v62 = vmul.f32 %v782_v60, %v1960_v43  ;;  %1704 = vpow2.f32 %v751_v7  ;;  %v749_v9 = vsub.f32 %v725_v55, %v743_v61  ;;  %v1227_v7 = vld [vmem:[%s2184_s10] sm:$0xff] }
 0x357   : > { %873 = vrot.lane.b32.xlu1 %v792_v62, %s1788_s26  ;;  %v755_v11 = vmul.f32 1.442695, %v749_v9  ;;  %v1330_v9 = vld [vmem:[%s2186_s12 + $0x70] sm:$0xff] }
 0x358   : > { %v746_v63 = vpop.xlane.xlu0 %745 }
 0x359   : > { %v750_v8 = vsub.f32 %v1578_v54, %v746_v63 }
 0x35b   : > { %v757_v10 = vmul.f32 1.442695, %v750_v8  ;;  %v1331_v8 = vld [vmem:[%s2186_s12 + $0x78] sm:$0xff] }
 0x35c   : > { %v780_v1 = vpop.permute.xlu0 %779 }
 0x35d   : > { %v791_v2 = vmul.f32 %v780_v1, %v1960_v43  ;;  %1706 = vpow2.f32 %v757_v10  ;;  %v1329_v10 = vld [vmem:[%s2186_s12 + $0x68] sm:$0xff] }
 0x35e   : > { %1708 = vpow2.f32 %v755_v11  ;;  %v1328_v11 = vld [vmem:[%s2186_s12 + $0x60] sm:$0xff] }
 0x35f   : > { %796 = vrot.lane.b32.xlu0 %v791_v2, %s1788_s26 }
 0x360   : > { %v1703_v12 = vpop.eup %1702  ;;  %v784_v20 = vpop.permute.xlu0 %783 }
 0x361   : > { %v762_v14 = vsel %vm734_vm2, %v1703_v12, 0.0  ;;  %v793_v21 = vmul.f32 %v784_v20, %v1960_v43 }
 0x362   : > { %v1705_v13 = vpop.eup %1704 }
 0x363   : > { %v759_v15 = vsel %vm734_vm2, %v1705_v13, 0.0 }
 0x364   : > { %v786_v22 = vpop.permute.xlu0 %785 }
 0x365   : > { %v794_v23 = vmul.f32 %v786_v22, %v1960_v43  ;;  %v1110_v43 = vld [vmem:[%s2180_s6] sm:$0xff] }
 0x366   : > { %v1506_v22 = vld [vmem:[%s2182_s8] ss:$0 sm:$0xff] }
 0x36a   : > { %v1707_v16 = vpop.eup %1706 }
 0x36b   : > { %v768_v17 = vsel %vm734_vm2, %v1707_v16, 0.0  ;;  %v1709_v18 = vpop.eup %1708 }
 0x36c   : > { %v765_v19 = vsel %vm734_vm2, %v1709_v18, 0.0 }
 0x37b   : > { %763 = vadd.xlane.f32.xlu1 %v762_v14 }
 0x37e   : > { %760 = vadd.xlane.f32.xlu0 %v759_v15 }
 0x382   : > { %769 = vadd.xlane.f32.xlu0 %v768_v17 }
 0x386   : > { %766 = vadd.xlane.f32.xlu0 %v765_v19 }
 0x38c   : > { %950 = vrot.lane.b32.xlu1 %v793_v21, %s1788_s26 }
 0x39c   : > { %1027 = vrot.lane.b32.xlu0 %v794_v23, %s1788_s26 }
 0x3c9   : > { %v874_v24 = vpop.permute.xlu1 %873 }
 0x3ca   : > { %1585 = vmatpush3.msra.mxu1 %v874_v24  ;;  %v1507_v24 = vld [vmem:[%s2183_s9] ss:$0 sm:$0xff] }
 0x3cb   : > { %1594 = vmatprep.subr.mxu1 %v1784_v5 }
 0x3d1   : > { %v797_v25 = vpop.permute.xlu0 %796 }
 0x3d2   : > { %1580 = vmatpush3.msra.mxu0 %v797_v25 }
 0x3d3   : > { %1589 = vmatprep.subr.mxu0 %v1784_v5 }
 0x404   : > { %v764_v26 = vpop.xlane.xlu1 %763 }
 0x405   : > { %1710 = vrcp.f32 %v764_v26 }
 0x407   : > { %v761_v27 = vpop.xlane.xlu0 %760 }
 0x408   : > { %1712 = vrcp.f32 %v761_v27  ;;  %v951_v35 = vpop.permute.xlu1 %950  ;;  %v1327_v27 = vld [vmem:[%s2186_s12 + $0x58] sm:$0xff] }
 0x40b   : > { %v770_v28 = vpop.xlane.xlu0 %769 }
 0x40c   : > { %1714 = vrcp.f32 %v770_v28  ;;  %v1326_v28 = vld [vmem:[%s2186_s12 + $0x50] sm:$0xff] }
 0x40f   : > { %v767_v29 = vpop.xlane.xlu0 %766 }
 0x410   : > { %1716 = vrcp.f32 %v767_v29  ;;  %v1325_v29 = vld [vmem:[%s2186_s12 + $0x48] sm:$0xff] }
 0x412   : > { %v1711_v30 = vpop.eup %1710 }
 0x413   : > { %v776_v31 = vmul.f32 %v1711_v30, %v1703_v12  ;;  %v1028_v32 = vpop.permute.xlu0 %1027  ;;  %v1324_v30 = vld [vmem:[%s2186_s12 + $0x40] sm:$0xff] }
 0x415   : > { %v1713_v33 = vpop.eup %1712  ;;  %1587 = vmatmul.mubr.msk.f32.vlgmr.msra.gmra.mxu1 %vm734_vm2, %v776_v31  ;;  %v1323_v31 = vld [vmem:[%s2186_s12 + $0x38] sm:$0xff] }
 0x416   : > { %1595 = vmatpush3.msra.mxu1 %v1028_v32  ;;  %v775_v34 = vmul.f32 %v1713_v33, %v1705_v13  ;;  %1596 = vmatprep.mubr.msk.f32.mxu1 %vm1785_vm1, %v1784_v5  ;;  %v1322_v32 = vld [vmem:[%s2186_s12 + $0x30] sm:$0xff]  ;;  %v1321_v33 = vld [vmem:[%s2186_s12 + $0x28] sm:$0xff] }
 0x417   : > { %1599 = vmatprep.subr.mxu1 %v1784_v5 }
 0x418   : > { %1582 = vmatmul.mubr.msk.f32.vlgmr.msra.gmra.mxu0 %vm734_vm2, %v775_v34  ;;  %v1320_v34 = vld [vmem:[%s2186_s12 + $0x20] sm:$0xff] }
 0x419   : > { %v1715_v36 = vpop.eup %1714  ;;  %1590 = vmatpush3.msra.mxu0 %v951_v35  ;;  %1591 = vmatprep.mubr.msk.f32.mxu0 %vm1785_vm1, %v1784_v5  ;;  %v1319_v35 = vld [vmem:[%s2186_s12 + $0x18] sm:$0xff] }
 0x41a   : > { %v778_v37 = vmul.f32 %v1715_v36, %v1707_v16  ;;  %1621 = vmatprep.subr.mxu0 %v1784_v5  ;;  %v1318_v36 = vld [vmem:[%s2186_s12 + $0x10] sm:$0xff] }
 0x41c   : > { %1597 = vmatmul.mubr.msk.f32.vlgmr.msra.gmra.mxu1 %vm734_vm2, %v778_v37  ;;  %v1317_v37 = vld [vmem:[%s2186_s12 + $0x8] sm:$0xff] }
 0x41d   : > { %v1717_v38 = vpop.eup %1716  ;;  %1607 = vmatprep.mubr.msk.f32.mxu1 %vm1785_vm1, %v1784_v5  ;;  %1600 = vmatpush3.msra.mxu1 %v1113_v40 }
 0x41e   : > { %v777_v39 = vmul.f32 %v1717_v38, %v1709_v18  ;;  %1601 = vmatprep.subr.mxu1 %v1784_v5  ;;  %v1316_v38 = vld [vmem:[%s2186_s12] sm:$0xff] }
 0x41f   : > { %1602 = vmatpush3.msra.mxu1 %v1112_v41 }
 0x420   : > { %1592 = vmatmul.mubr.msk.f32.vlgmr.msra.gmra.mxu0 %vm734_vm2, %v777_v39  ;;  %1603 = vmatprep.subr.mxu1 %v1784_v5  ;;  %v1508_v39 = vld [vmem:[%s2185_s11] ss:$0 sm:$0xff] }
 0x421   : > { %1653 = vmatprep.mubr.msk.f32.mxu0 %vm1785_vm1, %v1784_v5  ;;  %1604 = vmatpush3.msra.mxu1 %v1111_v42 }
 0x422   : > { %1605 = vmatprep.subr.mxu1 %v1784_v5  ;;  %1622 = vmatpush3.msra.mxu0 %v1331_v8 }
 0x423   : > { %1606 = vmatpush3.msra.mxu1 %v1110_v43  ;;  %1623 = vmatprep.subr.mxu0 %v1784_v5 }
 0x424   : > { %1610 = vmatprep.subr.mxu1 %v1784_v5  ;;  %1624 = vmatpush3.msra.mxu0 %v1330_v9 }
 0x425   : > { %1625 = vmatprep.subr.mxu0 %v1784_v5 }
 0x426   : > { %1626 = vmatpush3.msra.mxu0 %v1329_v10 }
 0x427   : > { %1627 = vmatprep.subr.mxu0 %v1784_v5 }
 0x428   : > { %1628 = vmatpush3.msra.mxu0 %v1328_v11 }
 0x429   : > { %1629 = vmatprep.subr.mxu0 %v1784_v5 }
 0x42a   : > { %1630 = vmatpush3.msra.mxu0 %v1327_v27 }
 0x42b   : > { %1631 = vmatprep.subr.mxu0 %v1784_v5 }
 0x42c   : > { %1632 = vmatpush3.msra.mxu0 %v1326_v28 }
 0x42d   : > { %1633 = vmatprep.subr.mxu0 %v1784_v5 }
 0x42e   : > { %1634 = vmatpush3.msra.mxu0 %v1325_v29 }
 0x42f   : > { %1635 = vmatprep.subr.mxu0 %v1784_v5 }
 0x430   : > { %1636 = vmatpush3.msra.mxu0 %v1324_v30 }
 0x431   : > { %1637 = vmatprep.subr.mxu0 %v1784_v5 }
 0x432   : > { %1638 = vmatpush3.msra.mxu0 %v1323_v31 }
 0x433   : > { %1639 = vmatprep.subr.mxu0 %v1784_v5 }
 0x434   : > { %1640 = vmatpush3.msra.mxu0 %v1322_v32 }
 0x435   : > { %1641 = vmatprep.subr.mxu0 %v1784_v5 }
 0x436   : > { %1642 = vmatpush3.msra.mxu0 %v1321_v33 }
 0x437   : > { %1643 = vmatprep.subr.mxu0 %v1784_v5 }
 0x438   : > { %1644 = vmatpush3.msra.mxu0 %v1320_v34 }
 0x439   : > { %1645 = vmatprep.subr.mxu0 %v1784_v5 }
 0x43a   : > { %1646 = vmatpush3.msra.mxu0 %v1319_v35 }
 0x43b   : > { %1647 = vmatprep.subr.mxu0 %v1784_v5 }
 0x43c   : > { %1648 = vmatpush3.msra.mxu0 %v1318_v36 }
 0x43d   : > { %1649 = vmatprep.subr.mxu0 %v1784_v5 }
 0x43e   : > { %1650 = vmatpush3.msra.mxu0 %v1317_v37 }
 0x43f   : > { %1651 = vmatprep.subr.mxu0 %v1784_v5 }
 0x440   : > { %1652 = vmatpush3.msra.mxu0 %v1316_v38 }
 0x4d5   : > { %v945_v44 = vpop.f32.mrf.mxu1 }
 0x4d6   : > { %v1104_v51 = vsel %vm467_vm0, %v945_v44, 0.0 }
 0x4d7   : > { %v1588_v45 = vpop.f32.mrf.mxu1 }
 0x4d8   : > { %v868_v46 = vpop.f32.mrf.mxu0 }
 0x4d9   : > { %v1103_v49 = vsel %vm467_vm0, %v868_v46, 0.0 }
 0x4da   : > { %v1583_v47 = vpop.f32.mrf.mxu0  ;;  %v1105_v52 = vadd.f32 %v1104_v51, %v1103_v49 }
 0x4dc   : > { %v1099_v48 = vpop.f32.mrf.mxu1 }
 0x4dd   : > { %v1108_v57 = vsel %vm467_vm0, %v1099_v48, 0.0 }
 0x4de   : > { %v1598_v50 = vpop.f32.mrf.mxu1 }
 0x4e0   : > { %v1022_v53 = vpop.f32.mrf.mxu0 }
 0x4e1   : > { %v1106_v54 = vsel %vm467_vm0, %v1022_v53, 0.0 }
 0x4e2   : > { %v1107_v55 = vadd.f32 %v1106_v54, %v1105_v52  ;;  %v1593_v56 = vpop.f32.mrf.mxu0 }
 0x4e4   : > { %v1109_v58 = vadd.f32 %v1108_v57, %v1107_v55 }
 0x4e6   : > { %1608 = vmatmul.mubr.msk.f32.vlgmr.msra.gmra.mxu1 %vm467_vm0, %v1109_v58 }
 0x4e7   : > { %1618 = vmatprep.mubr.msk.f32.mxu1 %vm1785_vm1, %v1784_v5  ;;  %1611 = vmatpush3.msra.mxu1 %v1230_v4 }
 0x4e8   : > { %1612 = vmatprep.subr.mxu1 %v1784_v5 }
 0x4e9   : > { %1613 = vmatpush3.msra.mxu1 %v1229_v6 }
 0x4ea   : > { %1614 = vmatprep.subr.mxu1 %v1784_v5 }
 0x5a6   : > { %v1190_v60 = vpop.f32.mrf.mxu1 }
 0x5a7   : > { %v1191_v61 = vadd.f32 %v1504_v59, %v1190_v60 }
 0x5a8   : > { %v1609_v62 = vpop.f32.mrf.mxu1 }
 0x5a9   : > { %v2039_v63 = vadd.f32 %v1191_v61, %v1918_v0  ;;  %v1228_v0 = vld [vmem:[%s2184_s10 + $0x8] sm:$0xff] }
 0x5aa   : > { %1615 = vmatpush3.msra.mxu1 %v1228_v0 }
 0x5ab   : > { %v1197_v1 = vsel %vm467_vm0, %v2039_v63, 0.0  ;;  %v1201_v2 = vmul.f32 %v2039_v63, %v2039_v63  ;;  %1616 = vmatprep.subr.mxu1 %v1784_v5  ;;  %v1510_v5 = vld [vmem:[%s2187_s13] ss:$0 sm:$0xff] }
 0x5ac   : > { %1198 = vadd.xlane.f32.xlu1 %v1197_v1  ;;  %1617 = vmatpush3.msra.mxu1 %v1227_v7 }
 0x5ad   : > { %v1202_v3 = vsel %vm467_vm0, %v1201_v2, 0.0 }
 0x5ae   : > { %1203 = vadd.xlane.f32.xlu0 %v1202_v3 }
 0x635   : > { %v1199_v12 = vpop.xlane.xlu1 %1198 }
 0x636   : > { %v1200_v13 = vmul.f32 0.03125, %v1199_v12 }
 0x637   : > { %v1204_v14 = vpop.xlane.xlu0 %1203 }
 0x638   : > { %v1206_v15 = vmul.f32 %v1200_v13, %v1200_v13  ;;  %v1205_v16 = vmul.f32 0.03125, %v1204_v14  ;;  %v1209_v20 = vsub.f32 %v2039_v63, %v1200_v13 }
 0x63a   : > { %v1207_v17 = vsub.f32 %v1205_v16, %v1206_v15 }
 0x63c   : > { %v1208_v18 = vmax.f32 %v1207_v17, 0.0 }
 0x63e   : > { %v1210_v19 = vadd.f32 1e-05, %v1208_v18 }
 0x640   : > { %1718 = vrsqrt.f32 %v1210_v19 }
 0x64d   : > { %v1719_v21 = vpop.eup %1718 }
 0x64e   : > { %v1212_v23 = vmul.f32 %v1719_v21, %v1209_v20 }
 0x650   : > { %v1219_v25 = vmul.f32 %v1506_v22, %v1212_v23 }
 0x652   : > { %v1226_v26 = vadd.f32 %v1507_v24, %v1219_v25 }
 0x654   : > { %1619 = vmatmul.mubr.msk.f32.vlgmr.msra.gmra.mxu1 %vm467_vm0, %v1226_v26 }
 0x714   : > { %v1307_v40 = vpop.f32.mrf.mxu1 }
 0x715   : > { %v1308_v41 = vadd.f32 %v1508_v39, %v1307_v40 }
 0x716   : > { %v1620_v42 = vpop.f32.mrf.mxu1 }
 0x717   : > { %v1312_v43 = vmul.f32 0.70710677, %v1308_v41  ;;  %v1311_v45 = vmul.f32 0.5, %v1308_v41 }
 0x719   : > { %1720 = verf.f32 %v1312_v43 }
 0x726   : > { %v1721_v44 = vpop.eup %1720 }
 0x727   : > { %v1314_v46 = vadd.f32 1.0, %v1721_v44 }
 0x729   : > { %v1315_v47 = vmul.f32 %v1314_v46, %v1311_v45 }
 0x72b   : > { %1654 = vmatmul.mubr.f32.vlgmr.msra.gmra.mxu0 %v1315_v47 }
 0x7eb   : > { %v1405_v48 = vpop.f32.mrf.mxu0 }
 0x7ec   : > { %v1406_v49 = vadd.f32 %v1510_v5, %v1405_v48 }
 0x7ed   : > { %v1655_v50 = vpop.f32.mrf.mxu0 }
 0x7ee   : > { %v1409_v51 = vadd.f32 %v1406_v49, %v2039_v63 }
 0x7f0   : > { %1410 = vst.msk [vmem:[%s458_s21] sm:$0xff] %vm467_vm0, %v1409_v51 }
 0x7f1   : > { %1735 = shalt.err (!%p1732_p3)
}
 0x7f2   : > { %s1736_s1 = scalar_lea.hbm %s1423_s2, 128  ;;  %s1740_s20 = scalar_lea.hbm %s2188_s14, 256 }
 0x7f3   : > { %p1737_p4 = scmp.ne.s32.totalorder %s1423_s2, %s1736_s1  ;;  %p1741_p9 = scmp.lt.s32.totalorder %s1423_s2, %s2188_s14 }
 0x7f4   : > { %p1742_p10 = scmp.lt.s32.totalorder %s1740_s20, %s1736_s1 }
 0x7f5   : > { %p1738_p7 = pnand %p1737_p4, %p1903_p5 }
 0x7f6   : > { %p1743_p11 = por %p1742_p10, %p1741_p9 }
 0x7f7   : > { %p1739_p8 = pneg %p1738_p7 }
 0x7f9   : > { %p1744_p12 = pnand %p1743_p11, %p1739_p8 }
 0x7fb   : > { %1747 = shalt.err (!%p1744_p12)
}
 0x7fc   : > { %1656 = dma.vmem_to_hbm [thread:$0]  (%p1903_p5), %s1426_s25, 128, %s1423_s2, %s1412_s3  }
 0x7fd PF: > { %p1662_p13 = scmp.ge.s32.totalorder %s1782_s16, 2  ;;  %s1437_s4 = sand.u32 1, %s1770_s29  }
 0x7fe   : > { %s1438_s17 = scalar_lea.sflag [#allocation3], %s1437_s4 }
 0x7ff   : > { %p1659_p0 = pnand %p1662_p13, %p1907_p6 }
 0x801   : > { %p1660_p1 = pneg %p1659_p0 }
 0x803   : > { %1765 = dma.done.wait (%p1660_p1), %s1438_s17, 128  }
 0x804   : > { %1767 = vsyncadd (%p1660_p1), %s1438_s17, 4294967168  ;;  %p24_p2 = scmp.ge.s32.totalorder %s1890_s19, 4   ;;  %s2201_s29 = smov %s1774_s30 }
 0x805   : > { %s2202_s30 = smov %s1778_s15  ;;  %s2203_s15 = smov %s1901_s22 }
 0x806   : > { %s2204_s16 = smov %s1890_s19  ;;  %26 = sbr.rel (!%p24_p2) target bundleno = 9 (0x9), region = 111 }
 0x80b   :  { %1443 = vsyncpa [#allocation3], 1 }
 0x80c   :  { %1445 = vsyncpa [#allocation3 + $0x1], 1 }

</bundles_post_ra>
